<compile_context>
chip_gen: v5e
topology: v5e:2x2
jax: 0.10.0
libtpu: 0.0.40
codegen_flags: <defaults>
</compile_context>

<pallas_src>
import functools

import jax
import jax.numpy as jnp
from jax.experimental import pallas as pl
from jax.experimental.pallas import tpu as pltpu


def _round_up(v, m):
    return ((v + m - 1) // m) * m


def _pick_hw_block(hw, bb, cpad, fpad, vmem_budget_bytes=24 * 1024 * 1024):
    """Largest divisor of hw (8-aligned or == hw) whose per-step working set
    (double-buffered bf16 input block + f32 feat temp) fits the budget."""
    def bytes_for(thw):
        x_blk = 2 * bb * thw * cpad * 2          # double-buffered bf16 input
        feat = bb * thw * fpad * 4               # f32 matmul result temp
        return x_blk + feat

    if bytes_for(hw) <= vmem_budget_bytes:
        return hw
    best = None
    for d in range(1, hw + 1):
        if hw % d:
            continue
        if d != hw and d % 8:
            continue
        if bytes_for(d) <= vmem_budget_bytes:
            best = d
    return best if best is not None else hw


def _densenet_fe_kernel(x_ref, wf_ref, bf_ref, wc_ref, bc_ref,
                        pool_ref, fc_ref, acc_ref, *, inv_hw):
    # Grid: (batch chunk [parallel], HW tile [arbitrary, reduction]).
    # x_ref:    (bb, THW, Cpad)  bf16   batch-chunk of flattened-spatial input
    # wf_ref:   (Cpad, Fpad)     bf16   stand-in "features" 1x1 conv weight
    # bf_ref:   (1, Fpad)        f32    features bias
    # wc_ref:   (Fpad, Kpad)     bf16   classifier weight (pre-transposed)
    # bc_ref:   (1, Kpad)        f32    classifier bias
    # pool_ref: (bb, Fpad)       f32    relu + global-avg-pool out ('avgpool')
    # fc_ref:   (bb, Kpad)       f32    classifier out ('fc')
    # acc_ref:  (bb, Fpad)       f32    spatial-sum accumulator (VMEM scratch)
    hi = pl.program_id(1)

    @pl.when(hi == 0)
    def _():
        acc_ref[...] = jnp.zeros_like(acc_ref)

    bb, thw, cpad = x_ref.shape
    # "features": 1x1 conv == one big channel matmul on the MXU
    # (bb*THW, Cpad) @ (Cpad, Fpad), bf16 operands, f32 accumulation.
    x = x_ref[...].reshape(bb * thw, cpad)
    feat = jnp.dot(x, wf_ref[...], preferred_element_type=jnp.float32)
    # bias + F.relu in f32 (VPU), then partial spatial sum into accumulator.
    feat = jnp.maximum(feat + bf_ref[...], 0.0)
    acc_ref[...] += feat.reshape(bb, thw, -1).sum(axis=1)

    @pl.when(hi == pl.num_programs(1) - 1)
    def _():
        # torch.mean(out, (2, 3))
        pooled = acc_ref[...] * inv_hw                       # (bb, Fpad) f32
        pool_ref[...] = pooled.astype(pool_ref.dtype)
        # self.classifier(out): ONE (bb, Fpad) @ (Fpad, Kpad) matmul per chunk.
        logits = jnp.dot(pooled.astype(wc_ref.dtype), wc_ref[...],
                         preferred_element_type=jnp.float32) + bc_ref[...]
        fc_ref[...] = logits.astype(fc_ref.dtype)


def densenet_feature_extractor(x_nchw, wf, bf, wc_t, bc,
                               extracted_layers=("avgpool", "fc"),
                               batch_block=None, hw_block=None):
    """x_nchw: (N, C, H, W) float32.  Returns a list per `extracted_layers`."""
    N, C, H, W = x_nchw.shape
    HW = H * W
    Cfeat = wf.shape[1]
    NCLS = wc_t.shape[1]

    # Lane-dense padded widths (zero-padded weights/bias -> math unchanged).
    Cpad = _round_up(C, 128)
    Fpad = _round_up(Cfeat, 128)
    Kpad = _round_up(NCLS, 128)

    # Batch chunk: full batch unless N is large and 8-divisible (keeps the
    # (bb, 128k) output blocks layout-legal and gives v7x a parallel axis).
    if batch_block is None:
        batch_block = 8 if (N > 8 and N % 8 == 0) else N
    bb = batch_block
    assert N % bb == 0 and (bb == N or bb % 8 == 0)

    # HW reduction tile: biggest divisor of HW whose working set fits VMEM.
    if hw_block is None:
        hw_block = _pick_hw_block(HW, bb, Cpad, Fpad)
    thw = hw_block
    assert HW % thw == 0 and (thw == HW or thw % 8 == 0)

    # Glue: NCHW -> (N, HW, C) with channels on lanes, zero-pad channels to a
    # full 128-lane width, cast MXU operands to bf16 (accum stays f32).
    x = jnp.transpose(x_nchw, (0, 2, 3, 1)).reshape(N, HW, C)
    x = jnp.pad(x, ((0, 0), (0, 0), (0, Cpad - C))).astype(jnp.bfloat16)
    wf_p = jnp.pad(wf, ((0, Cpad - C), (0, Fpad - Cfeat))).astype(jnp.bfloat16)
    bf_p = jnp.pad(bf, (0, Fpad - Cfeat)).reshape(1, Fpad).astype(jnp.float32)
    wc_p = jnp.pad(wc_t, ((0, Fpad - Cfeat), (0, Kpad - NCLS))).astype(jnp.bfloat16)
    bc_p = jnp.pad(bc, (0, Kpad - NCLS)).reshape(1, Kpad).astype(jnp.float32)

    grid = (N // bb, HW // thw)

    pool_out, fc_out = pl.pallas_call(
        functools.partial(_densenet_fe_kernel, inv_hw=1.0 / HW),
        out_shape=(
            jax.ShapeDtypeStruct((N, Fpad), jnp.float32),
            jax.ShapeDtypeStruct((N, Kpad), jnp.float32),
        ),
        grid_spec=pltpu.PrefetchScalarGridSpec(
            num_scalar_prefetch=0,
            grid=grid,
            in_specs=[
                pl.BlockSpec((bb, thw, Cpad), lambda bi, hi: (bi, hi, 0)),
                pl.BlockSpec((Cpad, Fpad), lambda bi, hi: (0, 0)),
                pl.BlockSpec((1, Fpad), lambda bi, hi: (0, 0)),
                pl.BlockSpec((Fpad, Kpad), lambda bi, hi: (0, 0)),
                pl.BlockSpec((1, Kpad), lambda bi, hi: (0, 0)),
            ],
            out_specs=[
                pl.BlockSpec((bb, Fpad), lambda bi, hi: (bi, 0)),
                pl.BlockSpec((bb, Kpad), lambda bi, hi: (bi, 0)),
            ],
            scratch_shapes=[pltpu.VMEM((bb, Fpad), jnp.float32)],
        ),
        compiler_params=pltpu.CompilerParams(
            dimension_semantics=("parallel", "arbitrary"),
            vmem_limit_bytes=48 * 1024 * 1024),
    )(x, wf_p, bf_p, wc_p, bc_p)

    # Slice padded lanes back off (padding is zero-filled, so no leakage).
    pool_out = pool_out[:, :Cfeat]   # (N, Cfeat) -- 'avgpool'
    fc_out = fc_out[:, :NCLS]        # (N, NCLS)  -- 'fc'

    outputs = []
    if "avgpool" in extracted_layers:
        outputs.append(pool_out)
    if "fc" in extracted_layers:
        outputs.append(fc_out)
    return outputs


def _reference(x_nchw, wf, bf, wc_t, bc):
    # Pure-JAX reference of the same forward pass with matching bf16 operand
    # rounding (accumulation / elementwise in f32, as in the kernel).
    N, C, H, W = x_nchw.shape
    x = jnp.transpose(x_nchw, (0, 2, 3, 1)).reshape(N, H * W, C)
    xb = x.astype(jnp.bfloat16).astype(jnp.float32)
    wfb = wf.astype(jnp.bfloat16).astype(jnp.float32)
    feat = jnp.einsum("nsc,cf->nsf", xb, wfb) + bf[None, None, :]
    feat = jnp.maximum(feat, 0.0)
    pooled = jnp.mean(feat, axis=1)
    wcb = wc_t.astype(jnp.bfloat16).astype(jnp.float32)
    pooled_b = pooled.astype(jnp.bfloat16).astype(jnp.float32)
    logits = pooled_b @ wcb + bc[None, :]
    return pooled, logits


if __name__ == "__main__":
    # Small shapes consistent with the module's forward.
    N, C, H, W = 2, 4, 16, 16
    CFEAT, NCLS = 32, 10

    key = jax.random.PRNGKey(0)
    kx, kwf, kbf, kwc, kbc = jax.random.split(key, 5)

    x = jax.random.normal(kx, (N, C, H, W), dtype=jnp.float32)
    # Stand-in "features" 1x1 conv parameters.
    wf = jax.random.normal(kwf, (C, CFEAT), dtype=jnp.float32) * 0.1
    bf = jax.random.normal(kbf, (CFEAT,), dtype=jnp.float32) * 0.1
    # Classifier (nn.Linear(CFEAT, NCLS)): torch weight is (NCLS, CFEAT);
    # pass it pre-transposed as (CFEAT, NCLS).
    wc_t = jax.random.normal(kwc, (CFEAT, NCLS), dtype=jnp.float32) * 0.1
    bc = jax.random.normal(kbc, (NCLS,), dtype=jnp.float32) * 0.1

    # hw_block=128 -> 2 HW reduction steps, exercising the accumulator path.
    outs = densenet_feature_extractor(x, wf, bf, wc_t, bc,
                                      extracted_layers=("avgpool", "fc"),
                                      hw_block=128)
    outs = [jax.block_until_ready(o) for o in outs]

    ref_pool, ref_fc = _reference(x, wf, bf, wc_t, bc)
    assert outs[0].shape == (N, CFEAT) and outs[1].shape == (N, NCLS)
    assert jnp.allclose(outs[0], ref_pool, atol=1e-3, rtol=1e-3)
    assert jnp.allclose(outs[1], ref_fc, atol=5e-3, rtol=5e-3)

    # Also exercise the auto hw_block path (single HW step here).
    outs2 = densenet_feature_extractor(x, wf, bf, wc_t, bc)
    outs2 = [jax.block_until_ready(o) for o in outs2]
    assert jnp.allclose(outs2[0], ref_pool, atol=1e-3, rtol=1e-3)
    assert jnp.allclose(outs2[1], ref_fc, atol=5e-3, rtol=5e-3)

    print("KERNEL_OK")
</pallas_src>

<mosaic_0001>
module attributes {stable_mosaic.version = 11 : i64} {
  func.func @_densenet_fe_kernel(%arg0: i32, %arg1: i32, %arg2: memref<2x128x128xbf16, #tpu.memory_space<vmem>>, %arg3: memref<128x128xbf16, #tpu.memory_space<vmem>>, %arg4: memref<1x128xf32, #tpu.memory_space<vmem>>, %arg5: memref<128x128xbf16, #tpu.memory_space<vmem>>, %arg6: memref<1x128xf32, #tpu.memory_space<vmem>>, %arg7: memref<2x128xf32, #tpu.memory_space<vmem>>, %arg8: memref<2x128xf32, #tpu.memory_space<vmem>>, %arg9: memref<2x128xf32, #tpu.memory_space<vmem>>) attributes {dimension_semantics = [#tpu.dimension_semantics<parallel>, #tpu.dimension_semantics<arbitrary>], iteration_bounds = array<i64: 1, 2>, scalar_prefetch = 0 : i64, scratch_operands = 1 : i64, tpu.core_type = #tpu.core_type<tc>, window_params = [{transform_indices = @transform_0, window_bounds = array<i64: 2, 128, 128>}, {pipeline_mode = #tpu.pipeline_mode<synchronous>, transform_indices = @transform_1, window_bounds = array<i64: 128, 128>}, {pipeline_mode = #tpu.pipeline_mode<synchronous>, transform_indices = @transform_2, window_bounds = array<i64: 1, 128>}, {pipeline_mode = #tpu.pipeline_mode<synchronous>, transform_indices = @transform_3, window_bounds = array<i64: 128, 128>}, {pipeline_mode = #tpu.pipeline_mode<synchronous>, transform_indices = @transform_4, window_bounds = array<i64: 1, 128>}, {transform_indices = @transform_5, window_bounds = array<i64: 2, 128>}, {transform_indices = @transform_6, window_bounds = array<i64: 2, 128>}]} {
    %c0_i32 = arith.constant 0 : i32
    %0 = arith.cmpi eq, %arg1, %c0_i32 : i32
    %1 = arith.extui %0 : i1 to i32
    %c0_i32_0 = arith.constant 0 : i32
    %2 = arith.cmpi ne, %1, %c0_i32_0 : i32
    scf.if %2 {
      %cst_14 = arith.constant 0.000000e+00 : f32
      %20 = vector.broadcast %cst_14 : f32 to vector<2x128xf32>
      %c0_15 = arith.constant 0 : index
      %c0_16 = arith.constant 0 : index
      %21 = vector.load %arg9[%c0_15, %c0_16] : memref<2x128xf32, #tpu.memory_space<vmem>>, vector<2x128xf32>
      tpu.vector_store %arg9[%c0_15, %c0_16], %20 {strides = array<i32>} : memref<2x128xf32, #tpu.memory_space<vmem>>, vector<2x128xf32>,
    } else {
    }
    %c0 = arith.constant 0 : index
    %c0_1 = arith.constant 0 : index
    %c0_2 = arith.constant 0 : index
    %3 = vector.load %arg2[%c0, %c0_1, %c0_2] : memref<2x128x128xbf16, #tpu.memory_space<vmem>>, vector<2x128x128xbf16>
    %4 = vector.shape_cast %3 : vector<2x128x128xbf16> to vector<256x128xbf16>
    %c0_3 = arith.constant 0 : index
    %c0_4 = arith.constant 0 : index
    %5 = vector.load %arg3[%c0_3, %c0_4] : memref<128x128xbf16, #tpu.memory_space<vmem>>, vector<128x128xbf16>
    %cst = arith.constant dense<0.000000e+00> : vector<256x128xf32>
    %6 = tpu.matmul %4, %5, %cst {dimension_numbers = #tpu.dot_dimension_numbers<[1], [0], [0], [1], [0, 0, 1, 1], [], []>} : vector<256x128xbf16>, vector<128x128xbf16>, vector<256x128xf32> -> vector<256x128xf32>
    %c0_5 = arith.constant 0 : index
    %c0_6 = arith.constant 0 : index
    %7 = vector.load %arg4[%c0_5, %c0_6] : memref<1x128xf32, #tpu.memory_space<vmem>>, vector<1x128xf32>
    %8 = vector.broadcast %7 : vector<1x128xf32> to vector<256x128xf32>
    %9 = arith.addf %6, %8 : vector<256x128xf32>
    %cst_7 = arith.constant 0.000000e+00 : f32
    %10 = vector.broadcast %cst_7 : f32 to vector<256x128xf32>
    %11 = arith.maximumf %9, %10 : vector<256x128xf32>
    %c0_8 = arith.constant 0 : index
    %c0_9 = arith.constant 0 : index
    %12 = vector.load %arg9[%c0_8, %c0_9] : memref<2x128xf32, #tpu.memory_space<vmem>>, vector<2x128xf32>
    %13 = vector.shape_cast %11 : vector<256x128xf32> to vector<2x128x128xf32>
    %cst_10 = arith.constant dense<0.000000e+00> : vector<2x128xf32>
    %14 = vector.multi_reduction <add>, %13, %cst_10 [1] : vector<2x128x128xf32> to vector<2x128xf32>
    %15 = arith.addf %12, %14 : vector<2x128xf32>
    %c0_11 = arith.constant 0 : index
    %c0_12 = arith.constant 0 : index
    %16 = vector.load %arg9[%c0_11, %c0_12] : memref<2x128xf32, #tpu.memory_space<vmem>>, vector<2x128xf32>
    tpu.vector_store %arg9[%c0_11, %c0_12], %15 {strides = array<i32>} : memref<2x128xf32, #tpu.memory_space<vmem>>, vector<2x128xf32>,
    %c1_i32 = arith.constant 1 : i32
    %17 = arith.cmpi eq, %arg1, %c1_i32 : i32
    %18 = arith.extui %17 : i1 to i32
    %c0_i32_13 = arith.constant 0 : i32
    %19 = arith.cmpi ne, %18, %c0_i32_13 : i32
    scf.if %19 {
      %c0_14 = arith.constant 0 : index
      %c0_15 = arith.constant 0 : index
      %20 = vector.load %arg9[%c0_14, %c0_15] : memref<2x128xf32, #tpu.memory_space<vmem>>, vector<2x128xf32>
      %cst_16 = arith.constant 3.906250e-03 : f32
      %21 = vector.broadcast %cst_16 : f32 to vector<2x128xf32>
      %22 = arith.mulf %20, %21 : vector<2x128xf32>
      %c0_17 = arith.constant 0 : index
      %c0_18 = arith.constant 0 : index
      %23 = vector.load %arg7[%c0_17, %c0_18] : memref<2x128xf32, #tpu.memory_space<vmem>>, vector<2x128xf32>
      tpu.vector_store %arg7[%c0_17, %c0_18], %22 {strides = array<i32>} : memref<2x128xf32, #tpu.memory_space<vmem>>, vector<2x128xf32>,
      %24 = arith.truncf %22 : vector<2x128xf32> to vector<2x128xbf16>
      %c0_19 = arith.constant 0 : index
      %c0_20 = arith.constant 0 : index
      %25 = vector.load %arg5[%c0_19, %c0_20] : memref<128x128xbf16, #tpu.memory_space<vmem>>, vector<128x128xbf16>
      %cst_21 = arith.constant dense<0.000000e+00> : vector<2x128xf32>
      %26 = tpu.matmul %24, %25, %cst_21 {dimension_numbers = #tpu.dot_dimension_numbers<[1], [0], [0], [1], [0, 0, 1, 1], [], []>} : vector<2x128xbf16>, vector<128x128xbf16>, vector<2x128xf32> -> vector<2x128xf32>
      %c0_22 = arith.constant 0 : index
      %c0_23 = arith.constant 0 : index
      %27 = vector.load %arg6[%c0_22, %c0_23] : memref<1x128xf32, #tpu.memory_space<vmem>>, vector<1x128xf32>
      %28 = vector.broadcast %27 : vector<1x128xf32> to vector<2x128xf32>
      %29 = arith.addf %26, %28 : vector<2x128xf32>
      %c0_24 = arith.constant 0 : index
      %c0_25 = arith.constant 0 : index
      %30 = vector.load %arg8[%c0_24, %c0_25] : memref<2x128xf32, #tpu.memory_space<vmem>>, vector<2x128xf32>
      tpu.vector_store %arg8[%c0_24, %c0_25], %29 {strides = array<i32>} : memref<2x128xf32, #tpu.memory_space<vmem>>, vector<2x128xf32>,
    } else {
    }
    return
  }
  func.func @transform_0(%arg0: i32, %arg1: i32) -> (i32, i32, i32) {
    %c0_i32 = arith.constant 0 : i32
    %c0_i32_0 = arith.constant 0 : i32
    return %arg0, %arg1, %c0_i32 : i32, i32, i32
  }
  func.func @transform_1(%arg0: i32, %arg1: i32) -> (i32, i32) {
    %c0_i32 = arith.constant 0 : i32
    %c0_i32_0 = arith.constant 0 : i32
    %c0_i32_1 = arith.constant 0 : i32
    return %c0_i32, %c0_i32_0 : i32, i32
  }
  func.func @transform_2(%arg0: i32, %arg1: i32) -> (i32, i32) {
    %c0_i32 = arith.constant 0 : i32
    %c0_i32_0 = arith.constant 0 : i32
    %c0_i32_1 = arith.constant 0 : i32
    return %c0_i32, %c0_i32_0 : i32, i32
  }
  func.func @transform_3(%arg0: i32, %arg1: i32) -> (i32, i32) {
    %c0_i32 = arith.constant 0 : i32
    %c0_i32_0 = arith.constant 0 : i32
    %c0_i32_1 = arith.constant 0 : i32
    return %c0_i32, %c0_i32_0 : i32, i32
  }
  func.func @transform_4(%arg0: i32, %arg1: i32) -> (i32, i32) {
    %c0_i32 = arith.constant 0 : i32
    %c0_i32_0 = arith.constant 0 : i32
    %c0_i32_1 = arith.constant 0 : i32
    return %c0_i32, %c0_i32_0 : i32, i32
  }
  func.func @transform_5(%arg0: i32, %arg1: i32) -> (i32, i32) {
    %c0_i32 = arith.constant 0 : i32
    %c0_i32_0 = arith.constant 0 : i32
    return %arg0, %c0_i32 : i32, i32
  }
  func.func @transform_6(%arg0: i32, %arg1: i32) -> (i32, i32) {
    %c0_i32 = arith.constant 0 : i32
    %c0_i32_0 = arith.constant 0 : i32
    return %arg0, %c0_i32 : i32, i32
  }
}

</mosaic_0001>

<bundles_post_ra>
// kernel: tpu_custom_call.1
= control target key start
LH: loop header
LB: loop body
LE: loop exit
PB: predicated region body
PF: predicated region fallthrough
CT: control target
= control target key end

     0   :  { %12 = vsyncpa [#allocation4], 0  ;;  %s1698_s0 = inlined_call_operand.hbm [shape: bf16[2,256,128], index: 0, kind: input, shape index: {}]   ;;  %s1699_s1 = inlined_call_operand.hbm [shape: bf16[128,128], index: 1, kind: input, shape index: {}]   ;;  %s1700_s2 = inlined_call_operand.vmem [shape: f32[1,128], index: 2, kind: input, shape index: {}]   ;;  %s1701_s3 = inlined_call_operand.hbm [shape: bf16[128,128], index: 3, kind: input, shape index: {}]   ;;  %s1702_s4 = inlined_call_operand.vmem [shape: f32[1,128], index: 4, kind: input, shape index: {}]   ;;  %s1703_s5 = inlined_call_operand.hbm [shape: f32[2,128], index: 5, kind: output, shape index: {0}]   ;;  %s1704_s6 = inlined_call_operand.hbm [shape: f32[2,128], index: 6, kind: output, shape index: {1}]  }
   0x1   :  { %14 = vsyncpa [#allocation4 + $0x1], 0 }
   0x2   :  { %15 = vsyncpa [#allocation7], 0 }
   0x3   :  { %16 = vsyncpa [#allocation5], 0 }
   0x4   :  { %17 = vsyncpa [#allocation11], 0  ;;  %s1468_s21 = smov 0   ;;  %s1470_s22 = smov 0  }
   0x5   :  { %s1472_s23 = smov 0   ;;  %s1474_s24 = smov 0  }
   0x6   :  { %s1476_s25 = smov 0   ;;  %s1478_s26 = smov 0  }
   0x7 LB: > { %s1705_s27 = sadd.s32 4294967295, %s1418_s26   ;;  %s32_s28 = sadd.s32 1, %s1414_s25  ;;  %s1418_s26 = sphi %s1478_s26, %s23_s26   ;;  %s1414_s25 = sphi %s1476_s25, %s1716_s25   ;;  %s1410_s24 = sphi %s1474_s24, %s1715_s24   ;;  %s1406_s23 = sphi %s1472_s23, %s1714_s23   ;;  %s1402_s22 = sphi %s1470_s22, %s1713_s22   ;;  %s1398_s21 = sphi %s1468_s21, %s1712_s21  }
   0x8   : > { %p33_p0 = scmp.ge.s32.totalorder %s32_s28, 2  ;;  %s44_s29 = sadd.s32 1, %s1406_s23 }
   0x9   : > { %p51_p1 = scmp.ne.s32.totalorder %s1406_s23, %s1402_s22  ;;  %p52_p2 = scmp.eq.s32.totalorder %s1418_s26, 0 }
   0xa   : > { %s1718_s28 = smov (%p33_p0, %s32_s28), 0  ;;  %p57_p4 = scmp.ne.s32.totalorder %s1402_s22, %s1398_s21 }
   0xb   : > { %p1504_p3 = por %p52_p2, %p51_p1  ;;  %s40_s7 = ssub.s32 %s1414_s25, %s1718_s28 }
   0xc   : > { %p1513_p5 = scmp.eq.s32.totalorder %s1705_s27, 0  ;;  %p42_p6 = scmp.eq.s32.totalorder %s40_s7, 0 }
   0xd   : > { %p931_p7 = scmp.ge.s32.totalorder %s1418_s26, 1  ;;  %p204_p9 = scmp.lt.s32.totalorder %s1418_s26, 3 }
   0xe   : > { %p1520_p8 = por %p1513_p5, %p57_p4  ;;  %s215_s14 = sshll.u32 %s1699_s1, 4  ;;  %s216_s14 = int_to_ptr.hbm [resolvable:$true] %s215_s14 }
   0xf   : > { %s1526_s10 = scalar_select %p42_p6, %s1406_s23, %s44_s29  }
  0x10   : > { %p1528_p10 = pnand %p931_p7, %p204_p9  ;;  %s1420_s15 = smov [#allocation6]  }
  0x11   : > { %s217_s16 = sshll.u32 %s1420_s15, 4  ;;  %s232_s19 = sshll.u32 %s1701_s3, 4  ;;  %s218_s16 = int_to_ptr.vmem [resolvable:$true] %s217_s16  ;;  %s233_s19 = int_to_ptr.hbm [resolvable:$true] %s232_s19 }
  0x12   : > { %p1162_p11 = pneg %p1528_p10  ;;  %s1421_s20 = smov 64  }
  0x13   : > { %s1422_s21 = smov 4   ;;  %s1423_s29 = smov [#allocation8]  }
  0x14   : > { %p1163_p12 = pnand %p1162_p11, %p1513_p5  ;;  %s234_s7 = sshll.u32 %s1423_s29, 4  ;;  %s235_s7 = int_to_ptr.vmem [resolvable:$true] %s234_s7 }
  0x15   : > { %p934_p13 = scmp.ge.s32.totalorder %s1418_s26, 2 }
  0x16   : > { %1165 = dma.hbm_to_vmem [thread:$0]  (!%p1163_p12), %s216_s14, 1024, %s218_s16, [#allocation7], %s1421_s20, %s1421_s20, %s1422_s21  }
  0x17   : > { %1168 = dma.hbm_to_vmem [thread:$0]  (!%p1163_p12), %s233_s19, 1024, %s235_s7, [#allocation7], %s1421_s20, %s1421_s20, %s1422_s21  }
  0x18   : > { %247 = sbr.rel (%p934_p13) target bundleno = 43 (0x2b), region = 32 }
  0x1d   : > { %s251_s12 = sand.u32 1, %s1406_s23   ;;  %s1080_s13 = sshll.u32 %s1414_s25, 6 }
  0x1e   : > { %s935_s15 = sshll.u32 %s251_s12, 7  ;;  %s263_s14 = scalar_lea.hbm %s1698_s0, %s1080_s13 }
  0x1f   : > { %s1141_s16 = scalar_select %p1504_p3, [#allocation0], [#allocation14] }
  0x20   : > { %s276_s19 = sshll.u32 %s263_s14, 4  ;;  %s255_s20 = scalar_lea.vmem [#allocation3], %s935_s15  ;;  %s277_s19 = int_to_ptr.hbm [resolvable:$true] %s276_s19 }
  0x21   : > { %s278_s21 = sshll.u32 %s255_s20, 4  ;;  %s268_s29 = sld [smem:[%s1141_s16]]   ;;  %s279_s21 = int_to_ptr.vmem [resolvable:$true] %s278_s21 }
  0x22   : > { %s1424_s7 = smov 2048   ;;  %s1425_s27 = smov 1024  }
  0x23   : > { %1142 = sst [smem:[#allocation13]] (%p1504_p3), %s1424_s7  ;;  %s1426_s17 = smov 16  }
  0x24   : > { %1143 = sst [smem:[#allocation13 + $0x1]] (%p1504_p3), %s1425_s27  ;;  %s1427_s13 = smov 64  }
  0x25   : > { %1144 = sst [smem:[#allocation13 + $0x2]] (%p1504_p3), %s1426_s17  ;;  %s1428_s14 = smov 4  }
  0x26   : > { %1145 = sst [smem:[#allocation13 + $0x3]] (%p1504_p3), %s1427_s13  ;;  %s252_s16 = scalar_lea.sflag [#allocation4], %s251_s12 }
  0x27   : > { %s938_s18 = sshll.u32 %s268_s29, 26  ;;  %1146 = sst [smem:[#allocation13 + $0x4]] (%p1504_p3), %s1427_s13 }
  0x28   : > { %s939_s15 = sadd.s32 134217728, %s938_s18  ;;  %1147 = sst [smem:[#allocation13 + $0x5]] (%p1504_p3), %s1428_s14 }
  0x29   : > { %s1429_s20 = smov [#allocation12]  }
  0x2a   : > { %1148 = dma.general (%p1504_p3), %s277_s19, 2048, %s279_s21, %s252_s16, %s1429_s20, [#allocation13], %s939_s15, 0  }
  0x2b PF: > { %303 = sbr.rel (%p1528_p10) target bundleno = 494 (0x1ee), region = 40  ;;  %s305_s27 = sand.u32 (!%p1528_p10), 1, %s1402_s22  }
  0x2c   : > { %s941_s7 = sshll.u32 (!%p1528_p10), %s305_s27, 7  ;;  %s306_s17 = scalar_lea.sflag (!%p1528_p10), [#allocation4], %s305_s27 }
  0x2d   : > { %s1567_s29 = scalar_lea.vmem (!%p1528_p10), [#allocation3], %s941_s7 }
  0x30   : > { %1381 = dma.done.wait (%p1520_p8), %s306_s17, 2048  }
  0x31   : > { %1383 = vsyncadd (%p1520_p8), %s306_s17, 4294965248 }
  0x32   : > { %1385 = dma.done.wait (%p1513_p5), [#allocation7], 2048  }
  0x33   : > { %1387 = vsyncadd (%p1513_p5), [#allocation7], 4294965248  ;;  %p944_p0 = scmp.ne.s32.totalorder %s1410_s24, 0 }
  0x35   : > { %349 = sbr.rel (%p944_p0) target bundleno = 60 (0x3c), region = 56 }
  0x3a   : > { %v1430_v0 = vmov 0.0  }
  0x3b   : > { %350 = vst [vmem:[#allocation2] sm:$0x3] %v1430_v0 }
  0x3c PF: > { %v1104_v1 = vld [vmem:[#allocation6 + $0x38] sm:$0xff]  ;;  %v1103_v2 = vld [vmem:[#allocation6 + $0x30] sm:$0xff]  ;;  %v1102_v3 = vld [vmem:[#allocation6 + $0x28] sm:$0xff]  ;;  %vm713_vm0 = vcmask 1041409   ;;  %p1041_p1 = scmp.ne.s32.totalorder %s1410_s24, 1 }
  0x3d   : > { %547 = vmatpush.bf16.msra.mxu0 %v1104_v1  ;;  %1114 = vmatpush.bf16.msra.mxu2 %v1104_v1  ;;  %v1101_v4 = vld [vmem:[#allocation6 + $0x20] sm:$0xff]  ;;  %v1100_v5 = vld [vmem:[#allocation6 + $0x18] sm:$0xff]  ;;  %v1099_v6 = vld [vmem:[#allocation6 + $0x10] sm:$0xff] }
  0x3e   : > { %1115 = vmatpush.bf16.msra.mxu3 %v1104_v1  ;;  %1113 = vmatpush.bf16.msra.mxu1 %v1104_v1  ;;  %v1098_v7 = vld [vmem:[#allocation6 + $0x8] sm:$0xff]  ;;  %v1097_v8 = vld [vmem:[#allocation6] sm:$0xff]  ;;  %v1083_v17 = vld [vmem:[%s1567_s29 + $0x10] sm:$0xff] }
  0x3f   : > { %v1081_v9 = vld [vmem:[%s1567_s29] sm:$0xff]  ;;  %v1082_v13 = vld [vmem:[%s1567_s29 + $0x8] sm:$0xff]  ;;  %v1091_v18 = vld [vmem:[%s1567_s29 + $0x50] sm:$0xff] }
  0x40   : > { %v1089_v10 = vld [vmem:[%s1567_s29 + $0x40] sm:$0xff]  ;;  %v1090_v14 = vld [vmem:[%s1567_s29 + $0x48] sm:$0xff]  ;;  %v1095_v19 = vld [vmem:[%s1567_s29 + $0x70] sm:$0xff] }
  0x41   : > { %548 = vmatpush.bf16.msra.mxu0 %v1103_v2  ;;  %1117 = vmatpush.bf16.msra.mxu2 %v1103_v2  ;;  %v1093_v11 = vld [vmem:[%s1567_s29 + $0x60] sm:$0xff]  ;;  %v1094_v15 = vld [vmem:[%s1567_s29 + $0x68] sm:$0xff]  ;;  %v1087_v20 = vld [vmem:[%s1567_s29 + $0x30] sm:$0xff] }
  0x42   : > { %1118 = vmatpush.bf16.msra.mxu3 %v1103_v2  ;;  %1116 = vmatpush.bf16.msra.mxu1 %v1103_v2  ;;  %v1085_v12 = vld [vmem:[%s1567_s29 + $0x20] sm:$0xff]  ;;  %v1086_v16 = vld [vmem:[%s1567_s29 + $0x28] sm:$0xff]  ;;  %v1084_v21 = vld [vmem:[%s1567_s29 + $0x18] sm:$0xff] }
  0x43   : > { %v1092_v22 = vld [vmem:[%s1567_s29 + $0x58] sm:$0xff] }
  0x44   : > { %v1096_v23 = vld [vmem:[%s1567_s29 + $0x78] sm:$0xff] }
  0x45   : > { %549 = vmatpush.bf16.msra.mxu0 %v1102_v3  ;;  %1120 = vmatpush.bf16.msra.mxu2 %v1102_v3  ;;  %v1088_v24 = vld [vmem:[%s1567_s29 + $0x38] sm:$0xff] }
  0x46   : > { %1121 = vmatpush.bf16.msra.mxu3 %v1102_v3  ;;  %1119 = vmatpush.bf16.msra.mxu1 %v1102_v3  ;;  %v1609_v44 = vld [vmem:[%s1700_s2] ss:$0 sm:$0xff] }
  0x49   : > { %550 = vmatpush.bf16.msra.mxu0 %v1101_v4  ;;  %1123 = vmatpush.bf16.msra.mxu2 %v1101_v4 }
  0x4a   : > { %1124 = vmatpush.bf16.msra.mxu3 %v1101_v4  ;;  %1122 = vmatpush.bf16.msra.mxu1 %v1101_v4 }
  0x4d   : > { %551 = vmatpush.bf16.msra.mxu0 %v1100_v5  ;;  %1126 = vmatpush.bf16.msra.mxu2 %v1100_v5 }
  0x4e   : > { %1127 = vmatpush.bf16.msra.mxu3 %v1100_v5  ;;  %1125 = vmatpush.bf16.msra.mxu1 %v1100_v5 }
  0x51   : > { %552 = vmatpush.bf16.msra.mxu0 %v1099_v6  ;;  %1129 = vmatpush.bf16.msra.mxu2 %v1099_v6 }
  0x52   : > { %1130 = vmatpush.bf16.msra.mxu3 %v1099_v6  ;;  %1128 = vmatpush.bf16.msra.mxu1 %v1099_v6 }
  0x55   : > { %553 = vmatpush.bf16.msra.mxu0 %v1098_v7  ;;  %1132 = vmatpush.bf16.msra.mxu2 %v1098_v7 }
  0x56   : > { %1133 = vmatpush.bf16.msra.mxu3 %v1098_v7  ;;  %1131 = vmatpush.bf16.msra.mxu1 %v1098_v7 }
  0x59   : > { %554 = vmatpush.bf16.msra.mxu0 %v1097_v8  ;;  %1135 = vmatpush.bf16.msra.mxu2 %v1097_v8 }
  0x5a   : > { %1136 = vmatpush.bf16.msra.mxu3 %v1097_v8  ;;  %1134 = vmatpush.bf16.msra.mxu1 %v1097_v8 }
  0x5c   : > { %555 = vmatmul.bf16.vlgmr.msra.gmra.mxu0 %v1081_v9  ;;  %595 = vmatmul.bf16.vlgmr.msra.gmra.mxu2 %v1089_v10 }
  0x5d   : > { %615 = vmatmul.bf16.vlgmr.msra.gmra.mxu3 %v1093_v11  ;;  %575 = vmatmul.bf16.vlgmr.msra.gmra.mxu1 %v1085_v12 }
  0x6c   : > { %560 = vmatmul.bf16.gmra.mxu0 %v1082_v13  ;;  %600 = vmatmul.bf16.gmra.mxu2 %v1090_v14 }
  0x6d   : > { %620 = vmatmul.bf16.gmra.mxu3 %v1094_v15  ;;  %580 = vmatmul.bf16.gmra.mxu1 %v1086_v16 }
  0x7c   : > { %565 = vmatmul.bf16.gmra.mxu0 %v1083_v17  ;;  %605 = vmatmul.bf16.gmra.mxu2 %v1091_v18 }
  0x7d   : > { %625 = vmatmul.bf16.gmra.mxu3 %v1095_v19  ;;  %585 = vmatmul.bf16.gmra.mxu1 %v1087_v20 }
  0x8c   : > { %570 = vmatmul.bf16.gmra.mxu0 %v1084_v21  ;;  %610 = vmatmul.bf16.gmra.mxu2 %v1092_v22 }
  0x8d   : > { %630 = vmatmul.bf16.gmra.mxu3 %v1096_v23  ;;  %590 = vmatmul.bf16.gmra.mxu1 %v1088_v24 }
  0xd9   : > { %v556_v25 = vpop.f32.mrf.mxu0 }
  0xda   : > { %v576_v26 = vpop.f32.mrf.mxu1  ;;  %v557_v47 = vadd.f32 %v1609_v44, %v556_v25 }
  0xdb   : > { %v577_v17 = vadd.f32 %v1609_v44, %v576_v26 }
  0xdc   : > { %v636_v54 = vmax.f32 %v557_v47, 0.0 }
  0xdf   : > { %v596_v27 = vpop.f32.mrf.mxu2 }
  0xe0   : > { %v1594_v28 = vpop.f32.mrf.mxu3  ;;  %v597_v57 = vadd.f32 %v1609_v44, %v596_v27 }
  0xe1   : > { %v558_v29 = vpop.f32.mrf.mxu0 }
  0xe2   : > { %v578_v30 = vpop.f32.mrf.mxu1  ;;  %v559_v46 = vadd.f32 %v1609_v44, %v558_v29  ;;  %v652_v5 = vmax.f32 %v597_v57, 0.0 }
  0xe3   : > { %v579_v24 = vadd.f32 %v1609_v44, %v578_v30 }
  0xe4   : > { %v637_v50 = vmax.f32 %v559_v46, 0.0 }
  0xe6   : > { %v669_v61 = vadd.f32 %v637_v50, %v636_v54 }
  0xe7   : > { %v598_v31 = vpop.f32.mrf.mxu2 }
  0xe8   : > { %v1596_v32 = vpop.f32.mrf.mxu3  ;;  %v599_v52 = vadd.f32 %v1609_v44, %v598_v31 }
  0xe9   : > { %v561_v33 = vpop.f32.mrf.mxu0 }
  0xea   : > { %v581_v34 = vpop.f32.mrf.mxu1  ;;  %v562_v48 = vadd.f32 %v1609_v44, %v561_v33  ;;  %v653_v0 = vmax.f32 %v599_v52, 0.0 }
  0xec   : > { %v638_v55 = vmax.f32 %v562_v48, 0.0  ;;  %v690_v10 = vadd.f32 %v653_v0, %v652_v5 }
  0xee   : > { %v670_v1 = vadd.f32 %v669_v61, %v638_v55 }
  0xef   : > { %v601_v35 = vpop.f32.mrf.mxu2 }
  0xf0   : > { %v1598_v37 = vpop.f32.mrf.mxu3  ;;  %v602_v58 = vadd.f32 %v1609_v44, %v601_v35  ;;  %v582_v35 = vadd.f32 %v1609_v44, %v581_v34 }
  0xf1   : > { %v563_v36 = vpop.f32.mrf.mxu0  ;;  %v622_v57 = vadd.f32 %v1609_v44, %v1598_v37 }
  0xf2   : > { %v1600_v38 = vpop.f32.mrf.mxu1  ;;  %v564_v51 = vadd.f32 %v1609_v44, %v563_v36  ;;  %v654_v6 = vmax.f32 %v602_v58, 0.0  ;;  %v644_v36 = vmax.f32 %v577_v17, 0.0  ;;  %v646_v34 = vmax.f32 %v582_v35, 0.0 }
  0xf3   : > { %v584_v47 = vadd.f32 %v1609_v44, %v1600_v38 }
  0xf4   : > { %v639_v62 = vmax.f32 %v564_v51, 0.0  ;;  %v691_v18 = vadd.f32 %v690_v10, %v654_v6  ;;  %v619_v51 = vadd.f32 %v1609_v44, %v1596_v32 }
  0xf5   : > { %v647_v58 = vmax.f32 %v584_v47, 0.0 }
  0xf6   : > { %v671_v7 = vadd.f32 %v670_v1, %v639_v62  ;;  %v661_v32 = vmax.f32 %v619_v51, 0.0 }
  0xf7   : > { %v603_v39 = vpop.f32.mrf.mxu2 }
  0xf8   : > { %v1602_v41 = vpop.f32.mrf.mxu3  ;;  %v604_v2 = vadd.f32 %v1609_v44, %v603_v39 }
  0xf9   : > { %v566_v40 = vpop.f32.mrf.mxu0  ;;  %v624_v0 = vadd.f32 %v1609_v44, %v1602_v41 }
  0xfa   : > { %v1604_v43 = vpop.f32.mrf.mxu1  ;;  %v567_v56 = vadd.f32 %v1609_v44, %v566_v40  ;;  %v655_v13 = vmax.f32 %v604_v2, 0.0 }
  0xfc   : > { %v640_v3 = vmax.f32 %v567_v56, 0.0  ;;  %v692_v27 = vadd.f32 %v691_v18, %v655_v13 }
  0xfe   : > { %v672_v14 = vadd.f32 %v671_v7, %v640_v3  ;;  %v662_v3 = vmax.f32 %v622_v57, 0.0 }
  0xff   : > { %v606_v42 = vpop.f32.mrf.mxu2 }
 0x100   : > { %v1614_v49 = vpop.f32.mrf.mxu3  ;;  %v607_v8 = vadd.f32 %v1609_v44, %v606_v42  ;;  %v617_v42 = vadd.f32 %v1609_v44, %v1594_v28 }
 0x101   : > { %v568_v45 = vpop.f32.mrf.mxu0 }
 0x102   : > { %v588_v60 = vpop.f32.mrf.mxu1  ;;  %v569_v63 = vadd.f32 %v1609_v44, %v568_v45  ;;  %v656_v20 = vmax.f32 %v607_v8, 0.0  ;;  %v645_v45 = vmax.f32 %v579_v24, 0.0  ;;  %v660_v56 = vmax.f32 %v617_v42, 0.0 }
 0x103   : > { %v589_v38 = vadd.f32 %v1609_v44, %v588_v60  ;;  %v663_v8 = vmax.f32 %v624_v0, 0.0 }
 0x104   : > { %v641_v9 = vmax.f32 %v569_v63, 0.0  ;;  %v693_v39 = vadd.f32 %v692_v27, %v656_v20 }
 0x105   : > { %v649_v37 = vmax.f32 %v589_v38, 0.0 }
 0x106   : > { %v673_v21 = vadd.f32 %v672_v14, %v641_v9 }
 0x107   : > { %v608_v53 = vpop.f32.mrf.mxu2 }
 0x108   : > { %v628_v12 = vpop.f32.mrf.mxu3  ;;  %v609_v15 = vadd.f32 %v1609_v44, %v608_v53  ;;  %v587_v53 = vadd.f32 %v1609_v44, %v1604_v43 }
 0x109   : > { %v571_v59 = vpop.f32.mrf.mxu0  ;;  %v629_v9 = vadd.f32 %v1609_v44, %v628_v12 }
 0x10a   : > { %v572_v4 = vadd.f32 %v1609_v44, %v571_v59  ;;  %v591_v25 = vpop.f32.mrf.mxu1  ;;  %v657_v29 = vmax.f32 %v609_v15, 0.0  ;;  %v648_v43 = vmax.f32 %v587_v53, 0.0 }
 0x10b   : > { %v592_v61 = vadd.f32 %v1609_v44, %v591_v25  ;;  %v665_v18 = vmax.f32 %v629_v9, 0.0 }
 0x10c   : > { %v642_v16 = vmax.f32 %v572_v4, 0.0  ;;  %v694_v30 = vadd.f32 %v693_v39, %v657_v29  ;;  %v627_v4 = vadd.f32 %v1609_v44, %v1614_v49 }
 0x10d   : > { %v650_v5 = vmax.f32 %v592_v61, 0.0 }
 0x10e   : > { %v674_v31 = vadd.f32 %v673_v21, %v642_v16  ;;  %v664_v13 = vmax.f32 %v627_v4, 0.0 }
 0x10f   : > { %v611_v11 = vpop.f32.mrf.mxu2 }
 0x110   : > { %v612_v22 = vadd.f32 %v1609_v44, %v611_v11  ;;  %v631_v52 = vpop.f32.mrf.mxu3 }
 0x111   : > { %v573_v19 = vpop.f32.mrf.mxu0  ;;  %v632_v15 = vadd.f32 %v1609_v44, %v631_v52 }
 0x112   : > { %v574_v23 = vadd.f32 %v1609_v44, %v573_v19  ;;  %v658_v26 = vmax.f32 %v612_v22, 0.0  ;;  %v593_v63 = vpop.f32.mrf.mxu1 }
 0x113   : > { %v594_v7 = vadd.f32 %v1609_v44, %v593_v63  ;;  %v666_v21 = vmax.f32 %v632_v15, 0.0 }
 0x114   : > { %v643_v33 = vmax.f32 %v574_v23, 0.0  ;;  %v695_v54 = vadd.f32 %v694_v30, %v658_v26 }
 0x115   : > { %v651_v17 = vmax.f32 %v594_v7, 0.0 }
 0x116   : > { %v675_v40 = vadd.f32 %v674_v31, %v643_v33 }
 0x117   : > { %v613_v46 = vpop.f32.mrf.mxu2 }
 0x118   : > { %v676_v48 = vadd.f32 %v675_v40, %v644_v36  ;;  %v614_v50 = vadd.f32 %v1609_v44, %v613_v46  ;;  %v633_v41 = vpop.f32.mrf.mxu3 }
 0x119   : > { %v634_v20 = vadd.f32 %v1609_v44, %v633_v41 }
 0x11a   : > { %v677_v55 = vadd.f32 %v676_v48, %v645_v45  ;;  %v659_v28 = vmax.f32 %v614_v50, 0.0  ;;  %v668_v45 = vld [vmem:[#allocation2] sm:$0x3] }
 0x11b   : > { %v667_v12 = vmax.f32 %v634_v20, 0.0 }
 0x11c   : > { %v678_v59 = vadd.f32 %v677_v55, %v646_v34  ;;  %v696_v62 = vadd.f32 %v695_v54, %v659_v28 }
 0x11e   : > { %v679_v1 = vadd.f32 %v678_v59, %v647_v58  ;;  %v697_v2 = vadd.f32 %v696_v62, %v660_v56 }
 0x120   : > { %v680_v60 = vadd.f32 %v679_v1, %v648_v43  ;;  %v698_v6 = vadd.f32 %v697_v2, %v661_v32 }
 0x122   : > { %v681_v10 = vadd.f32 %v680_v60, %v649_v37  ;;  %v699_v11 = vadd.f32 %v698_v6, %v662_v3 }
 0x124   : > { %v682_v14 = vadd.f32 %v681_v10, %v650_v5  ;;  %v700_v16 = vadd.f32 %v699_v11, %v663_v8 }
 0x126   : > { %v701_v49 = vadd.f32 %v700_v16, %v664_v13  ;;  %v683_v19 = vadd.f32 %v682_v14, %v651_v17 }
 0x128   : > { %v702_v22 = vadd.f32 %v701_v49, %v665_v18  ;;  %v684_v23 = vrot.slane %v683_v19, 4 }
 0x12a   : > { %v703_v24 = vadd.f32 %v702_v22, %v666_v21  ;;  %v685_v25 = vadd.f32 %v684_v23, %v683_v19 }
 0x12c   : > { %v686_v27 = vrot.slane %v685_v25, 2  ;;  %v704_v29 = vadd.f32 %v703_v24, %v667_v12 }
 0x12e   : > { %v705_v31 = vrot.slane %v704_v29, 4  ;;  %v687_v33 = vadd.f32 %v686_v27, %v685_v25 }
 0x130   : > { %v706_v35 = vadd.f32 %v705_v31, %v704_v29  ;;  %v688_v39 = vrot.slane %v687_v33, 1 }
 0x132   : > { %v707_v36 = vrot.slane %v706_v35, 2  ;;  %v689_v42 = vadd.f32 %v688_v39, %v687_v33 }
 0x134   : > { %v708_v26 = vadd.f32 %v707_v36, %v706_v35 }
 0x136   : > { %v709_v40 = vrot.slane %v708_v26, 1 }
 0x138   : > { %v710_v46 = vadd.f32 %v709_v40, %v708_v26 }
 0x139   : > { %721 = sbr.rel (%p1041_p1) target bundleno = 484 (0x1e4), region = 60 }
 0x13a   : > { %v714_v44 = vsel %vm713_vm0, %v710_v46, %v689_v42 }
 0x13b   : > { %v716_v47 = vadd.f32 %v714_v44, %v668_v45 }
 0x13d   : > { %717 = vst [vmem:[#allocation2] sm:$0x3] %v716_v47 }
 0x13e   : > { %v1112_v30 = vld [vmem:[#allocation8 + $0x38] sm:$0xff]  ;;  %v1111_v48 = vld [vmem:[#allocation8 + $0x30] sm:$0xff]  ;;  %v1110_v34 = vld [vmem:[#allocation8 + $0x28] sm:$0xff] }
 0x13f   : > { %794 = vmatpush.bf16.msra.mxu0 %v1112_v30  ;;  %v1109_v52 = vld [vmem:[#allocation8 + $0x20] sm:$0xff]  ;;  %v1108_v53 = vld [vmem:[#allocation8 + $0x18] sm:$0xff]  ;;  %v1107_v54 = vld [vmem:[#allocation8 + $0x10] sm:$0xff] }
 0x140   : > { %v1106_v55 = vld [vmem:[#allocation8 + $0x8] sm:$0xff]  ;;  %v1105_v28 = vld [vmem:[#allocation8] sm:$0xff]  ;;  %v1239_v57 = vld [vmem:[%s1702_s4] ss:$0 sm:$0xff] }
 0x143   : > { %795 = vmatpush.bf16.msra.mxu0 %v1111_v48 }
 0x144   : > { %v722_v50 = vld [vmem:[#allocation2] sm:$0x3] }
 0x145   : > { %v723_v51 = vmul.f32 0.00390625, %v722_v50 }
 0x147   : > { %724 = vst [vmem:[#allocation9] sm:$0x3] %v723_v51  ;;  %796 = vmatpush.bf16.msra.mxu0 %v1110_v34  ;;  %v725_v56 = vpack.c.bf16 %v723_v51, %v723_v51 }
 0x14b   : > { %797 = vmatpush.bf16.msra.mxu0 %v1109_v52 }
 0x14f   : > { %798 = vmatpush.bf16.msra.mxu0 %v1108_v53 }
 0x153   : > { %799 = vmatpush.bf16.msra.mxu0 %v1107_v54 }
 0x157   : > { %800 = vmatpush.bf16.msra.mxu0 %v1106_v55 }
 0x15b   : > { %801 = vmatpush.bf16.msra.mxu0 %v1105_v28 }
 0x15e   : > { %802 = vmatmul.bf16.vlgmr.msra.gmra.mxu0 %v725_v56 }
 0x1db   : > { %v803_v38 = vpop.f32.mrf.mxu0 }
 0x1dc   : > { %v804_v58 = vadd.f32 %v1239_v57, %v803_v38 }
 0x1de   : > { %807 = vst [vmem:[#allocation10] sm:$0x3] %v804_v58 }
 0x1e3   : > { %v805_v59 = vpop.f32.mrf.mxu0 }
 0x1e4 PF: > { %s1710_s11 = sadd.s32 4294967295, %s1418_s26   ;;  %s818_s13 = sshll.u32 %s1703_s5, 4  ;;  %s819_s13 = int_to_ptr.hbm [resolvable:$true] %s818_s13 }
 0x1e5   : > { %p1658_p2 = scmp.eq.s32.totalorder %s1710_s11, 1  ;;  %s1431_s18 = smov [#allocation9]  }
 0x1e6   : > { %s816_s15 = sshll.u32 %s1431_s18, 4  ;;  %s1432_s14 = smov [#allocation10]   ;;  %s817_s15 = int_to_ptr.vmem [resolvable:$true] %s816_s15 }
 0x1e7   : > { %1155 = dma.vmem_to_hbm [thread:$0]  (%p1658_p2), %s817_s15, 32, %s819_s13, [#allocation5]  }
 0x1e8   : > { %s830_s16 = sshll.u32 %s1432_s14, 4  ;;  %s832_s7 = sshll.u32 %s1704_s6, 4  ;;  %s831_s16 = int_to_ptr.vmem [resolvable:$true] %s830_s16  ;;  %s833_s7 = int_to_ptr.hbm [resolvable:$true] %s832_s7 }
 0x1e9   : > { %1157 = dma.vmem_to_hbm [thread:$0]  (%p1658_p2), %s831_s16, 32, %s833_s7, [#allocation11]  }
 0x1ea   : > { %1389 = dma.done.wait (%p1658_p2), [#allocation5], 32  }
 0x1eb   : > { %1391 = vsyncadd (%p1658_p2), [#allocation5], 4294967264 }
 0x1ec   : > { %1393 = dma.done.wait (%p1658_p2), [#allocation11], 32  }
 0x1ed   : > { %1395 = vsyncadd (%p1658_p2), [#allocation11], 4294967264 }
 0x1ee PF: > { %s23_s26 = sadd.s32 1, %s1418_s26   ;;  %s1712_s21 = smov %s1402_s22 }
 0x1ef   : > { %p20_p3 = scmp.ge.s32.totalorder %s23_s26, 4   ;;  %s1713_s22 = smov %s1406_s23 }
 0x1f0   : > { %s1714_s23 = smov %s1526_s10  ;;  %s1715_s24 = smov %s1414_s25 }
 0x1f1   : > { %s1716_s25 = smov %s1718_s28  ;;  %22 = sbr.rel (!%p20_p3) target bundleno = 7 (0x7), region = 108 }
 0x1f6   :  { %851 = vsyncpa [#allocation4], 1 }
 0x1f7   :  { %853 = vsyncpa [#allocation4 + $0x1], 1 }
 0x1f8   :  { %854 = vsyncpa [#allocation7], 1 }
 0x1f9   :  { %855 = vsyncpa [#allocation5], 1 }
 0x1fa   :  { %857 = vsyncpa [#allocation5 + $0x1], 1 }
 0x1fb   :  { %858 = vsyncpa [#allocation11], 1 }

</bundles_post_ra>
